<compile_context>
chip_gen: v7x
topology: tpu7x:2x2x1
jax: 0.10.0
libtpu: 0.0.40
codegen_flags: <defaults>
</compile_context>

<pallas_src>
import functools

import jax
import jax.numpy as jnp
from jax.experimental import pallas as pl
from jax.experimental.pallas import tpu as pltpu


def _row_copy(ids_smem, tok_hbm, tok_vmem, sems, base, slot, r):
    """Copy descriptor for one gathered token-embedding row (start and wait)."""
    vocab = tok_hbm.shape[0]
    tok_id = jnp.minimum(jnp.maximum(ids_smem[base + r], 0), vocab - 1)
    return pltpu.make_async_copy(
        tok_hbm.at[pl.ds(tok_id, 1), :],
        tok_vmem.at[slot, pl.ds(r, 1), :],
        sems.at[slot])


def bert_embeddings_kernel(ids_smem, tok_hbm, pos_ref, segid_ref, segtab_ref,
                           gamma_ref, beta_ref, out_ref, tok_vmem, sems, *,
                           eps, seq_len, batch):
    # ids_smem   : (B*S,) int32 in SMEM (scalar prefetch)
    # tok_hbm    : (V, E) token table, left in HBM (pl.ANY); rows DMA-gathered
    # pos_ref    : (ts, E)  position rows of sequence tile j (constant over b)
    # segid_ref  : (ts, 1)  int32 segment ids of tile (j, b)
    # segtab_ref : (3, E)   segment table
    # gamma/beta : (1, E)   LayerNorm affine params
    # out_ref    : (ts, E)  block of the flattened (B*S, E) output
    # tok_vmem   : (2, ts, E) double-buffered gather scratch
    # sems       : (2,)     one DMA semaphore per buffer slot
    _, ts, _ = tok_vmem.shape
    j = pl.program_id(0)          # sequence-tile index ("parallel", megacore-split)
    b = pl.program_id(1)          # batch index ("arbitrary": sequential per core)
    slot = b & 1

    def start_gather(tile_b, slot_idx):
        base = tile_b * seq_len + j * ts

        @pl.loop(0, ts)
        def _(r):
            _row_copy(ids_smem, tok_hbm, tok_vmem, sems, base, slot_idx, r).start()

    def wait_gather(tile_b, slot_idx):
        base = tile_b * seq_len + j * ts

        @pl.loop(0, ts)
        def _(r):
            _row_copy(ids_smem, tok_hbm, tok_vmem, sems, base, slot_idx, r).wait()

    # Prime the pipeline at the start of every inner (batch) loop.  The batch
    # axis is "arbitrary", so every core runs it from b == 0 regardless of how
    # the parallel j axis is sharded across TensorCores.
    @pl.when(b == 0)
    def _():
        start_gather(0, 0)

    # Wait for this tile's rows (started above, or prefetched at the previous
    # step).  Waits are rebuilt with the real token-id source slices so they
    # mirror the descriptors that were actually started.
    wait_gather(b, slot)

    # Prefetch the next batch row's tile into the other slot; those DMAs
    # complete underneath the LayerNorm work below.
    @pl.when(b + 1 < batch)
    def _():
        start_gather(b + 1, 1 - slot)

    tok = tok_vmem[slot].astype(jnp.float32)        # (ts, E)
    pos = pos_ref[...].astype(jnp.float32)          # (ts, E)

    # Segment embedding: 3-row VPU select (no MXU, no gather).
    segid = segid_ref[...]                          # (ts, 1) int32
    row0 = segtab_ref[0:1, :].astype(jnp.float32)   # (1, E)
    row1 = segtab_ref[1:2, :].astype(jnp.float32)
    row2 = segtab_ref[2:3, :].astype(jnp.float32)
    seg = jnp.where(segid == 1, row1, jnp.where(segid == 2, row2, row0))

    x = tok + pos + seg                             # (ts, E) f32

    # LayerNorm over the hidden dim -- two-pass statistics (well conditioned).
    mean = jnp.mean(x, axis=-1, keepdims=True)
    xc = x - mean
    var = jnp.mean(xc * xc, axis=-1, keepdims=True)
    y = xc * jax.lax.rsqrt(var + eps)
    y = y * gamma_ref[...].astype(jnp.float32) + beta_ref[...].astype(jnp.float32)

    # TODO(synk): training-mode dropout (p=0.1) omitted -- identity in eval mode.
    out_ref[...] = y.astype(out_ref.dtype)


def bert_embeddings(seq_ids, segment_ids, tok_table, pos_table, seg_table,
                    gamma, beta, *, eps=1e-6, tile_rows=None,
                    out_dtype=jnp.float32):
    """seq_ids, segment_ids: (B, S) int32.  Returns (B, S, E) in `out_dtype`.

    Tables may be bf16 (halves gather / pos HBM traffic); math runs in f32.
    Pass out_dtype=jnp.bfloat16 to halve the output write stream if the
    downstream consumer accepts it.
    """
    B, S = seq_ids.shape
    V, E = tok_table.shape
    NSEG = seg_table.shape[0]

    ts = min(S, 256) if tile_rows is None else tile_rows
    assert S % ts == 0 and ts % 8 == 0, "seq tile must divide S and be a multiple of 8"
    n_tiles = S // ts
    T = B * S

    ids_flat = seq_ids.astype(jnp.int32).reshape(T)
    if segment_ids is None:
        # forward() skips the segment add entirely when segment_label is None.
        segment_ids = jnp.zeros((B, S), jnp.int32)
        seg_table = jnp.zeros_like(seg_table)
    segid_col = segment_ids.astype(jnp.int32).reshape(T, 1)
    pos_slice = pos_table[:S]                       # (S, E) positions 0..S-1
    gamma2 = gamma.reshape(1, E)
    beta2 = beta.reshape(1, E)

    kernel = functools.partial(bert_embeddings_kernel, eps=eps, seq_len=S, batch=B)

    out_flat = pl.pallas_call(
        kernel,
        out_shape=jax.ShapeDtypeStruct((T, E), out_dtype),
        grid_spec=pltpu.PrefetchScalarGridSpec(
            num_scalar_prefetch=1,                                   # token ids -> SMEM
            grid=(n_tiles, B),                                       # j outer, b inner
            in_specs=[
                pl.BlockSpec(memory_space=pl.ANY),                   # token table stays in HBM
                pl.BlockSpec((ts, E), lambda j, b, ids: (j, 0)),     # pos rows: const over b
                pl.BlockSpec((ts, 1), lambda j, b, ids: (b * n_tiles + j, 0)),  # segment ids
                pl.BlockSpec((NSEG, E), lambda j, b, ids: (0, 0)),   # segment table (3 rows)
                pl.BlockSpec((1, E), lambda j, b, ids: (0, 0)),      # ln gamma
                pl.BlockSpec((1, E), lambda j, b, ids: (0, 0)),      # ln beta
            ],
            out_specs=pl.BlockSpec((ts, E), lambda j, b, ids: (b * n_tiles + j, 0)),
            scratch_shapes=[
                pltpu.VMEM((2, ts, E), tok_table.dtype),             # double-buffered gather
                pltpu.SemaphoreType.DMA((2,)),                       # one sem per slot
            ],
        ),
        compiler_params=pltpu.CompilerParams(
            # j is megacore-split; b carries the cross-step gather prefetch so
            # it must stay sequential on a single core.
            dimension_semantics=("parallel", "arbitrary")),
    )(ids_flat, tok_table, pos_slice, segid_col, seg_table, gamma2, beta2)

    return out_flat.reshape(B, S, E)


def reference(seq_ids, segment_ids, tok_table, pos_table, seg_table,
              gamma, beta, eps=1e-6):
    B, S = seq_ids.shape
    x = (tok_table[seq_ids]
         + pos_table[:S][None, :, :]
         + seg_table[segment_ids])
    mean = jnp.mean(x, axis=-1, keepdims=True)
    var = jnp.mean((x - mean) ** 2, axis=-1, keepdims=True)
    return (x - mean) * jax.lax.rsqrt(var + eps) * gamma + beta


if __name__ == "__main__":
    # Small, deterministic shapes consistent with the module's forward.
    vocab_size, embed_size, max_len = 64, 128, 16
    batch, seq_len = 2, 8

    key = jax.random.PRNGKey(0)
    k_tok, k_pos, k_seg, k_g, k_b, k_ids, k_sid = jax.random.split(key, 7)

    tok_table = jax.random.normal(k_tok, (vocab_size, embed_size), jnp.float32) * 0.02
    tok_table = tok_table.at[0].set(0.0)            # padding_idx=0
    pos_table = jax.random.normal(k_pos, (max_len, embed_size), jnp.float32) * 0.02
    seg_table = jax.random.normal(k_seg, (3, embed_size), jnp.float32) * 0.02
    seg_table = seg_table.at[0].set(0.0)            # padding_idx=0
    gamma = 1.0 + 0.1 * jax.random.normal(k_g, (embed_size,), jnp.float32)
    beta = 0.1 * jax.random.normal(k_b, (embed_size,), jnp.float32)

    seq_ids = jax.random.randint(k_ids, (batch, seq_len), 0, vocab_size, jnp.int32)
    segment_ids = jax.random.randint(k_sid, (batch, seq_len), 0, 3, jnp.int32)
    # (If segment_label were None, pass None: the wrapper zeroes the segment term.)

    out = bert_embeddings(seq_ids, segment_ids, tok_table, pos_table,
                          seg_table, gamma, beta)
    out = jax.block_until_ready(out)

    ref = reference(seq_ids, segment_ids, tok_table, pos_table,
                    seg_table, gamma, beta)
    assert out.shape == (batch, seq_len, embed_size)
    assert jnp.allclose(out, ref, atol=1e-4, rtol=1e-4), "mismatch vs reference"

    print("KERNEL_OK")
</pallas_src>

<mosaic_0001>
module attributes {stable_mosaic.version = 11 : i64} {
  func.func @bert_embeddings_kernel(%arg0: i32, %arg1: i32, %arg2: memref<16xi32, #tpu.memory_space<smem>>, %arg3: memref<64x128xf32, #tpu.memory_space<any>>, %arg4: memref<8x128xf32, #tpu.memory_space<vmem>>, %arg5: memref<8x1xi32, #tpu.memory_space<vmem>>, %arg6: memref<3x128xf32, #tpu.memory_space<vmem>>, %arg7: memref<1x128xf32, #tpu.memory_space<vmem>>, %arg8: memref<1x128xf32, #tpu.memory_space<vmem>>, %arg9: memref<8x128xf32, #tpu.memory_space<vmem>>, %arg10: memref<2x8x128xf32, #tpu.memory_space<vmem>>, %arg11: memref<2x!tpu.dma_semaphore, #tpu.memory_space<semaphore_mem>>) attributes {dimension_semantics = [#tpu.dimension_semantics<parallel>, #tpu.dimension_semantics<arbitrary>], iteration_bounds = array<i64: 1, 2>, scalar_prefetch = 1 : i64, scratch_operands = 2 : i64, tpu.core_type = #tpu.core_type<tc>, window_params = [{}, {transform_indices = @transform_1, window_bounds = array<i64: 8, 128>}, {transform_indices = @transform_2, window_bounds = array<i64: 8, 1>}, {pipeline_mode = #tpu.pipeline_mode<synchronous>, transform_indices = @transform_3, window_bounds = array<i64: 3, 128>}, {pipeline_mode = #tpu.pipeline_mode<synchronous>, transform_indices = @transform_4, window_bounds = array<i64: 1, 128>}, {pipeline_mode = #tpu.pipeline_mode<synchronous>, transform_indices = @transform_5, window_bounds = array<i64: 1, 128>}, {transform_indices = @transform_6, window_bounds = array<i64: 8, 128>}]} {
    %c1_i32 = arith.constant 1 : i32
    %0 = arith.andi %arg1, %c1_i32 : i32
    %c0_i32 = arith.constant 0 : i32
    %1 = arith.cmpi eq, %arg1, %c0_i32 : i32
    %2 = arith.extui %1 : i1 to i32
    %c0_i32_0 = arith.constant 0 : i32
    %3 = arith.cmpi ne, %2, %c0_i32_0 : i32
    scf.if %3 {
      %c8_i32_29 = arith.constant 8 : i32
      %61 = arith.muli %arg0, %c8_i32_29 : i32
      %c0_i32_30 = arith.constant 0 : i32
      %62 = arith.addi %c0_i32_30, %61 : i32
      %c0_i32_31 = arith.constant 0 : i32
      %c8_i32_32 = arith.constant 8 : i32
      %63 = arith.addi %c0_i32_31, %c8_i32_32 : i32
      %c1_i32_33 = arith.constant 1 : i32
      scf.for %arg12 = %c0_i32_31 to %63 step %c1_i32_33  : i32 {
        %c1_i32_35 = arith.constant 1 : i32
        %64 = arith.muli %arg12, %c1_i32_35 : i32
        %c0_i32_36 = arith.constant 0 : i32
        %65 = arith.addi %c0_i32_36, %64 : i32
        %66 = arith.addi %62, %65 : i32
        %67 = arith.index_cast %66 : i32 to index
        %68 = memref.load %arg2[%67] : memref<16xi32, #tpu.memory_space<smem>>
        %c0_i32_37 = arith.constant 0 : i32
        %69 = arith.maxsi %68, %c0_i32_37 : i32
        %c63_i32 = arith.constant 63 : i32
        %70 = arith.minsi %69, %c63_i32 : i32
        %c0_i32_38 = arith.constant 0 : i32
        %c0_i32_39 = arith.constant 0 : i32
        %c0_i32_40 = arith.constant 0 : i32
        %71 = tpu.memref_slice %arg3[%70, %c0_i32_40] : memref<64x128xf32, #tpu.memory_space<any>> -> memref<1x128xf32, #tpu.memory_space<any>>
        %c0_i32_41 = arith.constant 0 : i32
        %72 = tpu.memref_slice %arg10[%c0_i32_38, %65, %c0_i32_41] : memref<2x8x128xf32, #tpu.memory_space<vmem>> -> memref<1x1x128xf32, #tpu.memory_space<vmem>>
        %73 = tpu.memref_squeeze %72 : memref<1x1x128xf32, #tpu.memory_space<vmem>> -> memref<1x128xf32, #tpu.memory_space<vmem>>
        %74 = tpu.memref_slice %arg11[%c0_i32_39] : memref<2x!tpu.dma_semaphore, #tpu.memory_space<semaphore_mem>> -> memref<1x!tpu.dma_semaphore, #tpu.memory_space<semaphore_mem>>
        %75 = tpu.memref_squeeze %74 : memref<1x!tpu.dma_semaphore, #tpu.memory_space<semaphore_mem>> -> memref<!tpu.dma_semaphore, #tpu.memory_space<semaphore_mem>>
        tpu.enqueue_dma source(%71 : memref<1x128xf32, #tpu.memory_space<any>>) target(%73 : memref<1x128xf32, #tpu.memory_space<vmem>>) target_semaphore(%75 : memref<!tpu.dma_semaphore, #tpu.memory_space<semaphore_mem>>)
      }
      %c8_i32_34 = arith.constant 8 : i32
    } else {
    }
    %c8_i32 = arith.constant 8 : i32
    %4 = arith.muli %arg1, %c8_i32 : i32
    %c8_i32_1 = arith.constant 8 : i32
    %5 = arith.muli %arg0, %c8_i32_1 : i32
    %6 = arith.addi %4, %5 : i32
    %c0_i32_2 = arith.constant 0 : i32
    %c8_i32_3 = arith.constant 8 : i32
    %7 = arith.addi %c0_i32_2, %c8_i32_3 : i32
    %c1_i32_4 = arith.constant 1 : i32
    scf.for %arg12 = %c0_i32_2 to %7 step %c1_i32_4  : i32 {
      %c1_i32_29 = arith.constant 1 : i32
      %61 = arith.muli %arg12, %c1_i32_29 : i32
      %c0_i32_30 = arith.constant 0 : i32
      %62 = arith.addi %c0_i32_30, %61 : i32
      %63 = arith.addi %6, %62 : i32
      %64 = arith.index_cast %63 : i32 to index
      %65 = memref.load %arg2[%64] : memref<16xi32, #tpu.memory_space<smem>>
      %c0_i32_31 = arith.constant 0 : i32
      %66 = arith.maxsi %65, %c0_i32_31 : i32
      %c63_i32 = arith.constant 63 : i32
      %67 = arith.minsi %66, %c63_i32 : i32
      %c0_i32_32 = arith.constant 0 : i32
      %68 = tpu.memref_slice %arg3[%67, %c0_i32_32] : memref<64x128xf32, #tpu.memory_space<any>> -> memref<1x128xf32, #tpu.memory_space<any>>
      %c0_i32_33 = arith.constant 0 : i32
      %69 = tpu.memref_slice %arg10[%0, %62, %c0_i32_33] : memref<2x8x128xf32, #tpu.memory_space<vmem>> -> memref<1x1x128xf32, #tpu.memory_space<vmem>>
      %70 = tpu.memref_squeeze %69 : memref<1x1x128xf32, #tpu.memory_space<vmem>> -> memref<1x128xf32, #tpu.memory_space<vmem>>
      %71 = tpu.memref_slice %arg11[%0] : memref<2x!tpu.dma_semaphore, #tpu.memory_space<semaphore_mem>> -> memref<1x!tpu.dma_semaphore, #tpu.memory_space<semaphore_mem>>
      %72 = tpu.memref_squeeze %71 : memref<1x!tpu.dma_semaphore, #tpu.memory_space<semaphore_mem>> -> memref<!tpu.dma_semaphore, #tpu.memory_space<semaphore_mem>>
      tpu.wait_dma2 semaphore(%72 : memref<!tpu.dma_semaphore, #tpu.memory_space<semaphore_mem>>) src(%68 : memref<1x128xf32, #tpu.memory_space<any>>) dst(%70 : memref<1x128xf32, #tpu.memory_space<vmem>>)
    }
    %c8_i32_5 = arith.constant 8 : i32
    %c1_i32_6 = arith.constant 1 : i32
    %8 = arith.addi %arg1, %c1_i32_6 : i32
    %c2_i32 = arith.constant 2 : i32
    %9 = arith.cmpi slt, %8, %c2_i32 : i32
    %10 = arith.extui %9 : i1 to i32
    %c0_i32_7 = arith.constant 0 : i32
    %11 = arith.cmpi ne, %10, %c0_i32_7 : i32
    scf.if %11 {
      %c1_i32_29 = arith.constant 1 : i32
      %61 = arith.addi %arg1, %c1_i32_29 : i32
      %c1_i32_30 = arith.constant 1 : i32
      %62 = arith.subi %c1_i32_30, %0 : i32
      %c8_i32_31 = arith.constant 8 : i32
      %63 = arith.muli %61, %c8_i32_31 : i32
      %c8_i32_32 = arith.constant 8 : i32
      %64 = arith.muli %arg0, %c8_i32_32 : i32
      %65 = arith.addi %63, %64 : i32
      %c0_i32_33 = arith.constant 0 : i32
      %c8_i32_34 = arith.constant 8 : i32
      %66 = arith.addi %c0_i32_33, %c8_i32_34 : i32
      %c1_i32_35 = arith.constant 1 : i32
      scf.for %arg12 = %c0_i32_33 to %66 step %c1_i32_35  : i32 {
        %c1_i32_37 = arith.constant 1 : i32
        %67 = arith.muli %arg12, %c1_i32_37 : i32
        %c0_i32_38 = arith.constant 0 : i32
        %68 = arith.addi %c0_i32_38, %67 : i32
        %69 = arith.addi %65, %68 : i32
        %70 = arith.index_cast %69 : i32 to index
        %71 = memref.load %arg2[%70] : memref<16xi32, #tpu.memory_space<smem>>
        %c0_i32_39 = arith.constant 0 : i32
        %72 = arith.maxsi %71, %c0_i32_39 : i32
        %c63_i32 = arith.constant 63 : i32
        %73 = arith.minsi %72, %c63_i32 : i32
        %c0_i32_40 = arith.constant 0 : i32
        %74 = tpu.memref_slice %arg3[%73, %c0_i32_40] : memref<64x128xf32, #tpu.memory_space<any>> -> memref<1x128xf32, #tpu.memory_space<any>>
        %c0_i32_41 = arith.constant 0 : i32
        %75 = tpu.memref_slice %arg10[%62, %68, %c0_i32_41] : memref<2x8x128xf32, #tpu.memory_space<vmem>> -> memref<1x1x128xf32, #tpu.memory_space<vmem>>
        %76 = tpu.memref_squeeze %75 : memref<1x1x128xf32, #tpu.memory_space<vmem>> -> memref<1x128xf32, #tpu.memory_space<vmem>>
        %77 = tpu.memref_slice %arg11[%62] : memref<2x!tpu.dma_semaphore, #tpu.memory_space<semaphore_mem>> -> memref<1x!tpu.dma_semaphore, #tpu.memory_space<semaphore_mem>>
        %78 = tpu.memref_squeeze %77 : memref<1x!tpu.dma_semaphore, #tpu.memory_space<semaphore_mem>> -> memref<!tpu.dma_semaphore, #tpu.memory_space<semaphore_mem>>
        tpu.enqueue_dma source(%74 : memref<1x128xf32, #tpu.memory_space<any>>) target(%76 : memref<1x128xf32, #tpu.memory_space<vmem>>) target_semaphore(%78 : memref<!tpu.dma_semaphore, #tpu.memory_space<semaphore_mem>>)
      }
      %c8_i32_36 = arith.constant 8 : i32
    } else {
    }
    %12 = arith.index_cast %0 : i32 to index
    %c0 = arith.constant 0 : index
    %c0_8 = arith.constant 0 : index
    %13 = vector.load %arg10[%12, %c0, %c0_8] : memref<2x8x128xf32, #tpu.memory_space<vmem>>, vector<1x8x128xf32>
    %14 = vector.shape_cast %13 : vector<1x8x128xf32> to vector<8x128xf32>
    %c0_9 = arith.constant 0 : index
    %c0_10 = arith.constant 0 : index
    %15 = vector.load %arg4[%c0_9, %c0_10] : memref<8x128xf32, #tpu.memory_space<vmem>>, vector<8x128xf32>
    %c0_11 = arith.constant 0 : index
    %c0_12 = arith.constant 0 : index
    %16 = vector.load %arg5[%c0_11, %c0_12] : memref<8x1xi32, #tpu.memory_space<vmem>>, vector<8x1xi32>
    %c0_13 = arith.constant 0 : index
    %c0_14 = arith.constant 0 : index
    %17 = vector.load %arg6[%c0_13, %c0_14] : memref<3x128xf32, #tpu.memory_space<vmem>>, vector<1x128xf32>
    %c1 = arith.constant 1 : index
    %c0_15 = arith.constant 0 : index
    %18 = vector.load %arg6[%c1, %c0_15] : memref<3x128xf32, #tpu.memory_space<vmem>>, vector<1x128xf32>
    %c2 = arith.constant 2 : index
    %c0_16 = arith.constant 0 : index
    %19 = vector.load %arg6[%c2, %c0_16] : memref<3x128xf32, #tpu.memory_space<vmem>>, vector<1x128xf32>
    %c1_i32_17 = arith.constant 1 : i32
    %20 = vector.broadcast %c1_i32_17 : i32 to vector<8x1xi32>
    %21 = arith.cmpi eq, %16, %20 : vector<8x1xi32>
    %c2_i32_18 = arith.constant 2 : i32
    %22 = vector.broadcast %c2_i32_18 : i32 to vector<8x1xi32>
    %23 = arith.cmpi eq, %16, %22 : vector<8x1xi32>
    %24 = vector.shape_cast %23 : vector<8x1xi1> to vector<8x1xi1>
    %25 = vector.broadcast %24 : vector<8x1xi1> to vector<8x128xi1>
    %26 = vector.shape_cast %19 : vector<1x128xf32> to vector<1x128xf32>
    %27 = vector.broadcast %26 : vector<1x128xf32> to vector<8x128xf32>
    %28 = vector.shape_cast %17 : vector<1x128xf32> to vector<1x128xf32>
    %29 = vector.broadcast %28 : vector<1x128xf32> to vector<8x128xf32>
    %30 = arith.select %25, %27, %29 : vector<8x128xi1>, vector<8x128xf32>
    %31 = vector.shape_cast %21 : vector<8x1xi1> to vector<8x1xi1>
    %32 = vector.broadcast %31 : vector<8x1xi1> to vector<8x128xi1>
    %33 = vector.shape_cast %18 : vector<1x128xf32> to vector<1x128xf32>
    %34 = vector.broadcast %33 : vector<1x128xf32> to vector<8x128xf32>
    %35 = arith.select %32, %34, %30 : vector<8x128xi1>, vector<8x128xf32>
    %36 = arith.addf %14, %15 : vector<8x128xf32>
    %37 = arith.addf %36, %35 : vector<8x128xf32>
    %cst = arith.constant dense<0.000000e+00> : vector<8xf32>
    %38 = vector.multi_reduction <add>, %37, %cst [1] : vector<8x128xf32> to vector<8xf32>
    %39 = vector.shape_cast %38 : vector<8xf32> to vector<8x1xf32>
    %cst_19 = arith.constant 1.280000e+02 : f32
    %40 = vector.broadcast %cst_19 : f32 to vector<8x1xf32>
    %41 = arith.divf %39, %40 : vector<8x1xf32>
    %42 = vector.broadcast %41 : vector<8x1xf32> to vector<8x128xf32>
    %43 = arith.subf %37, %42 : vector<8x128xf32>
    %44 = arith.mulf %43, %43 : vector<8x128xf32>
    %cst_20 = arith.constant dense<0.000000e+00> : vector<8xf32>
    %45 = vector.multi_reduction <add>, %44, %cst_20 [1] : vector<8x128xf32> to vector<8xf32>
    %46 = vector.shape_cast %45 : vector<8xf32> to vector<8x1xf32>
    %cst_21 = arith.constant 1.280000e+02 : f32
    %47 = vector.broadcast %cst_21 : f32 to vector<8x1xf32>
    %48 = arith.divf %46, %47 : vector<8x1xf32>
    %cst_22 = arith.constant 9.99999997E-7 : f32
    %49 = vector.broadcast %cst_22 : f32 to vector<8x1xf32>
    %50 = arith.addf %48, %49 : vector<8x1xf32>
    %51 = math.rsqrt %50 : vector<8x1xf32>
    %52 = vector.broadcast %51 : vector<8x1xf32> to vector<8x128xf32>
    %53 = arith.mulf %43, %52 : vector<8x128xf32>
    %c0_23 = arith.constant 0 : index
    %c0_24 = arith.constant 0 : index
    %54 = vector.load %arg7[%c0_23, %c0_24] : memref<1x128xf32, #tpu.memory_space<vmem>>, vector<1x128xf32>
    %55 = vector.broadcast %54 : vector<1x128xf32> to vector<8x128xf32>
    %56 = arith.mulf %53, %55 : vector<8x128xf32>
    %c0_25 = arith.constant 0 : index
    %c0_26 = arith.constant 0 : index
    %57 = vector.load %arg8[%c0_25, %c0_26] : memref<1x128xf32, #tpu.memory_space<vmem>>, vector<1x128xf32>
    %58 = vector.broadcast %57 : vector<1x128xf32> to vector<8x128xf32>
    %59 = arith.addf %56, %58 : vector<8x128xf32>
    %c0_27 = arith.constant 0 : index
    %c0_28 = arith.constant 0 : index
    %60 = vector.load %arg9[%c0_27, %c0_28] : memref<8x128xf32, #tpu.memory_space<vmem>>, vector<8x128xf32>
    tpu.vector_store %arg9[%c0_27, %c0_28], %59 {strides = array<i32>} : memref<8x128xf32, #tpu.memory_space<vmem>>, vector<8x128xf32>,
    return
  }
  func.func @transform_1(%arg0: i32, %arg1: i32, %arg2: memref<16xi32, #tpu.memory_space<smem>>) -> (i32, i32) {
    %c0_i32 = arith.constant 0 : i32
    %c0_i32_0 = arith.constant 0 : i32
    return %arg0, %c0_i32 : i32, i32
  }
  func.func @transform_2(%arg0: i32, %arg1: i32, %arg2: memref<16xi32, #tpu.memory_space<smem>>) -> (i32, i32) {
    %c1_i32 = arith.constant 1 : i32
    %0 = arith.muli %arg1, %c1_i32 : i32
    %1 = arith.addi %0, %arg0 : i32
    %c0_i32 = arith.constant 0 : i32
    %c0_i32_0 = arith.constant 0 : i32
    return %1, %c0_i32 : i32, i32
  }
  func.func @transform_3(%arg0: i32, %arg1: i32, %arg2: memref<16xi32, #tpu.memory_space<smem>>) -> (i32, i32) {
    %c0_i32 = arith.constant 0 : i32
    %c0_i32_0 = arith.constant 0 : i32
    %c0_i32_1 = arith.constant 0 : i32
    return %c0_i32, %c0_i32_0 : i32, i32
  }
  func.func @transform_4(%arg0: i32, %arg1: i32, %arg2: memref<16xi32, #tpu.memory_space<smem>>) -> (i32, i32) {
    %c0_i32 = arith.constant 0 : i32
    %c0_i32_0 = arith.constant 0 : i32
    %c0_i32_1 = arith.constant 0 : i32
    return %c0_i32, %c0_i32_0 : i32, i32
  }
  func.func @transform_5(%arg0: i32, %arg1: i32, %arg2: memref<16xi32, #tpu.memory_space<smem>>) -> (i32, i32) {
    %c0_i32 = arith.constant 0 : i32
    %c0_i32_0 = arith.constant 0 : i32
    %c0_i32_1 = arith.constant 0 : i32
    return %c0_i32, %c0_i32_0 : i32, i32
  }
  func.func @transform_6(%arg0: i32, %arg1: i32, %arg2: memref<16xi32, #tpu.memory_space<smem>>) -> (i32, i32) {
    %c1_i32 = arith.constant 1 : i32
    %0 = arith.muli %arg1, %c1_i32 : i32
    %1 = arith.addi %0, %arg0 : i32
    %c0_i32 = arith.constant 0 : i32
    %c0_i32_0 = arith.constant 0 : i32
    return %1, %c0_i32 : i32, i32
  }
}

</mosaic_0001>

<bundles_post_ra>
// kernel: tpu_custom_call.1
= control target key start
LH: loop header
LB: loop body
LE: loop exit
PB: predicated region body
PF: predicated region fallthrough
CT: control target
= control target key end

     0   :  { %s1094_s0 = inlined_call_operand.vmem [shape: s32[16], index: 0, kind: input, shape index: {}]   ;;  %s1095_s1 = inlined_call_operand.hbm [shape: f32[64,128], index: 1, kind: input, shape index: {}]   ;;  %s1096_s2 = inlined_call_operand.vmem [shape: f32[8,128], index: 2, kind: input, shape index: {}]   ;;  %s1097_s3 = inlined_call_operand.vmem [shape: s32[16,1], index: 3, kind: input, shape index: {}]   ;;  %s1098_s4 = inlined_call_operand.vmem [shape: f32[3,128], index: 4, kind: input, shape index: {}]   ;;  %s1099_s5 = inlined_call_operand.vmem [shape: f32[1,128], index: 5, kind: input, shape index: {}]   ;;  %s1100_s6 = inlined_call_operand.vmem [shape: f32[1,128], index: 6, kind: input, shape index: {}]   ;;  %s1101_s7 = inlined_call_operand.hbm [shape: f32[16,128], index: 7, kind: output, shape index: {}]  }
   0x1   :  { %1107 = sst [smem:[#allocation23_spill]] %s1097_s3  ;;  %s12_s26 = sshll.u32 %s1094_s0, 4  ;;  %s13_s26 = int_to_ptr.vmem [resolvable:$true] %s12_s26 }
   0x2   :  { %s680_s27 = scalar_lea.vmem %s13_s26, 16  ;;  %p685_p1 = scmp.lt.s32.totalorder %s13_s26, %s13_s26 }
   0x3   :  { %p681_p0 = scmp.ne.s32.totalorder %s13_s26, %s680_s27  ;;  %p686_p2 = scmp.lt.s32.totalorder %s680_s27, %s680_s27 }
   0x5   :  { %p687_p3 = por %p686_p2, %p685_p1 }
   0x7   :  { %p688_p4 = pnand %p687_p3, %p681_p0 }
   0x9   :  { %691 = shalt.err (!%p688_p4)  }
   0xa   :  { %s848_s28 = smov [#allocation5]  }
   0xb   :  { %15 = dma.vmem_to_smem %s13_s26, 16, %s848_s28, [#allocation4] }
   0xc   :  { %804 = dma.done.wait [#allocation4], 16 }
   0xd   :  { %805 = vsyncadd [#allocation4], 4294967280 }
   0xe   :  { %17 = sfence }
   0xf   :  { %18 = vsyncpa [#allocation7], 0 }
  0x10   :  { %20 = vsyncpa [#allocation7 + $0x1], 0  ;;  %s896_s29 = smov 0   ;;  %s898_s30 = smov 0  }
  0x11   :  { %s900_s0 = smov 0   ;;  %s902_s8 = smov 0  }
  0x12   :  { %s904_s9 = smov 0   ;;  %s906_s10 = smov 0  }
  0x13 LB: > { %1108 = sst [smem:[#allocation17_spill]] %s822_s0  ;;  %s554_s11 = sadd.s32 4294967295, %s834_s10   ;;  %s834_s10 = sphi %s906_s10, %s26_s10   ;;  %s830_s9 = sphi %s904_s9, %s1126_s9   ;;  %s826_s8 = sphi %s902_s8, %s1125_s8   ;;  %s822_s0 = sphi %s900_s0, %s1124_s0   ;;  %s818_s30 = sphi %s898_s30, %s1128_s30   ;;  %s814_s29 = sphi %s896_s29, %s1127_s29  }
  0x14   : > { %1109 = sst [smem:[#allocation18_spill]] %s830_s9  ;;  %s555_s12 = sadd.s32 4294967294, %s834_s10  }
  0x15   : > { %s35_s13 = sadd.s32 1, %s830_s9  ;;  %s164_s14 = sadd.s32 1, %s822_s0 }
  0x16   : > { %p36_p5 = scmp.ge.s32.totalorder %s35_s13, 2  ;;  %p174_p6 = scmp.ne.s32.totalorder %s822_s0, %s818_s30 }
  0x17   : > { %p175_p7 = scmp.eq.s32.totalorder %s554_s11, 1  ;;  %p180_p8 = scmp.ne.s32.totalorder %s818_s30, %s814_s29 }
  0x18   : > { %s1130_s13 = smov (%p36_p5, %s35_s13), 0  ;;  %p181_p10 = scmp.eq.s32.totalorder %s555_s12, 1 }
  0x19   : > { %1110 = sst [smem:[#allocation19_spill]] %s1130_s13  ;;  %p936_p9 = por %p175_p7, %p174_p6 }
  0x1a   : > { %s161_s16 = ssub.s32 %s830_s9, %s1130_s13  ;;  %p559_p11 = scmp.ge.s32.totalorder %s834_s10, 1 }
  0x1b   : > { %p162_p12 = scmp.eq.s32.totalorder %s161_s16, 0  ;;  %p943_p13 = por %p181_p10, %p180_p8 }
  0x1c   : > { %p224_p0 = scmp.lt.s32.totalorder %s834_s10, 3 }
  0x1d   : > { %s1112_s17 = scalar_select %p943_p13, 1, 0 }
  0x1e   : > { %s949_s18 = scalar_select %p162_p12, %s822_s0, %s164_s14  }
  0x1f   : > { %1113 = sst [smem:[#allocation20_spill]] %s1112_s17  ;;  %p225_p1 = pnand %p559_p11, %p224_p0 }
  0x20   : > { %1114 = sst [smem:[#allocation21_spill]] %s949_s18 }
  0x21   : > { %228 = sbr.rel (%p225_p1) target bundleno = 629 (0x275), region = 40 }
  0x28   : > { %s1102_s19 = sand.u32 1, %s818_s30   ;;  %p261_p2 = scmp.lt.s32.totalorder %s826_s8, 1 }
  0x29   : > { %s955_s20 = sshll.u32 %s1102_s19, 3  ;;  %s958_s21 = sand.u32 1, %s826_s8 }
  0x2a   : > { %s262_s22 = scalar_select %p261_p2, %s826_s8, 1 }
  0x2b   : > { %s1115_s3 = sld [smem:[#allocation23_spill]]  ;;  %p562_p3 = scmp.ne.s32.totalorder %s826_s8, 0 }
  0x2c   : > { %s561_s23 = sshll.u32 %s262_s22, 3  ;;  %s968_s28 = smov (!%p562_p3), 0  }
  0x2d   : > { %271 = sbr.rel (%p562_p3) target bundleno = 95 (0x5f), region = 44 }
  0x31   : > { %s964_s26 = scalar_lea.vmem %s1115_s3, %s561_s23 }
  0x34 LB: >> { %s280_s11 = sld [smem:[#allocation5 + %s838_s28]]  ;;  %s287_s12 = scalar_lea.vmem [#allocation2], %s838_s28  ;;  %s838_s28 = sphi %s968_s28, %s278_s28  }
  0x35   : >> { %s295_s14 = sshll.u32 %s287_s12, 4  ;;  %s694_s3 = scalar_lea.hbm %s1095_s1, 1024  ;;  %s296_s14 = int_to_ptr.vmem [resolvable:$true] %s295_s14 }
  0x3a   : >> { %p281_p4 = scmp.gt.s32.totalorder %s280_s11, 0  ;;  %p563_p5 = scmp.lt.s32.totalorder %s280_s11, 63 }
  0x3c   : >> { %s1132_s11 = smov (!%p281_p4, %s280_s11), 0 }
  0x3d   : >> { %s1134_s11 = smov (!%p563_p5, %s1132_s11), 63 }
  0x3e   : >> { %s568_s16 = sshll.u32 %s1134_s11, 4 }
  0x3f   : >> { %s286_s24 = scalar_lea.hbm %s1095_s1, %s568_s16 }
  0x40   : >> { %s692_s25 = scalar_lea.hbm %s286_s24, 16  ;;  %p695_p7 = scmp.lt.u32.totalorder %s286_s24, %s1095_s1 }
  0x41   : >> { %p693_p6 = scmp.ne.s32.totalorder %s286_s24, %s692_s25  ;;  %p696_p8 = scmp.lt.u32.totalorder %s694_s3, %s692_s25 }
  0x42   : >> { %p698_p11 = scmp.lt.u32.totalorder %s692_s25, %s286_s24 }
  0x43   : >> { %p697_p10 = por %p696_p8, %p695_p7 }
  0x45   : >> { %p699_p12 = por %p698_p11, %p697_p10 }
  0x47   : >> { %p700_p0 = pnand %p699_p12, %p693_p6 }
  0x49   : >> { %703 = shalt.err (!%p700_p0)  }
  0x4a   : >> { %s704_s11 = scalar_lea.vmem %s296_s14, 16  ;;  %s849_s12 = smov [#allocation2]  }
  0x4b   : >> { %p705_p1 = scmp.ne.s32.totalorder %s296_s14, %s704_s11  ;;  %s706_s16 = sshll.u32 %s849_s12, 4  ;;  %s707_s16 = int_to_ptr.vmem [resolvable:$false] %s706_s16 }
  0x4c   : >> { %s708_s22 = scalar_lea.vmem %s707_s16, 256  ;;  %p709_p2 = scmp.lt.s32.totalorder %s296_s14, %s707_s16 }
  0x4d   : >> { %p710_p3 = scmp.lt.s32.totalorder %s708_s22, %s704_s11 }
  0x4f   : >> { %p711_p4 = por %p710_p3, %p709_p2 }
  0x51   : >> { %p712_p5 = pnand %p711_p4, %p705_p1 }
  0x53   : >> { %715 = shalt.err (!%p712_p5)  }
  0x54   : >> { %298 = dma.hbm_to_vmem [thread:$0]  %s286_s24, 16, %s296_s14, [#allocation3] }
  0x55   : >> { %s278_s28 = sadd.s32 1, %s838_s28  }
  0x56   : >> { %p275_p13 = scmp.ge.s32.totalorder %s278_s28, 8  }
  0x58   : > { %277 = sbr.rel (!%p275_p13) target bundleno = 52 (0x34), region = 123 }
  0x5f PF: > { %s840_s3 = smov 0  }
  0x60 LB: >> { %s310_s9 = scalar_lea.sflag [#allocation3], %s958_s21  ;;  %s842_s3 = sphi %s840_s3, %s307_s3  }
  0x61   : >> { %806 = dma.done.wait %s310_s9, 16 }
  0x62   : >> { %807 = vsyncadd %s310_s9, 4294967280  ;;  %s307_s3 = sadd.s32 1, %s842_s3  }
  0x63   : >> { %p304_p6 = scmp.ge.s32.totalorder %s307_s3, 8  }
  0x64   : > { %s314_s13 = sadd.s32 (%p304_p6), 1, %s826_s8 }
  0x65   : > { %306 = sbr.rel (!%p304_p6) target bundleno = 96 (0x60), region = 134  ;;  %p569_p7 = scmp.ge.s32.totalorder (%p304_p6), %s314_s13, 2 }
  0x6c   : > { %318 = sbr.rel (%p569_p7) target bundleno = 165 (0xa5), region = 66  ;;  %s319_s19 = ssub.s32 (!%p569_p7), 1, %s958_s21 }
  0x6d   : > { %s592_s27 = sshll.u32 (!%p569_p7), %s826_s8, 3  ;;  %s993_s14 = smov (!%p569_p7), 0  }
  0x6e   : > { %s991_s28 = sadd.s32 (!%p569_p7), 8, %s592_s27 }
  0x6f   : > { %1116 = sst [smem:[#allocation22_spill]] (!%p569_p7), %s991_s28 }
  0x73 LB: >> { %s1117_s28 = sld [smem:[#allocation22_spill]]  ;;  %s577_s23 = sshll.u32 %s319_s19, 3  ;;  %s846_s14 = sphi %s993_s14, %s327_s14  }
  0x74   : >> { %s337_s11 = sadd.s32 %s846_s14, %s577_s23  ;;  %s339_s27 = scalar_lea.sflag [#allocation3], %s319_s19 }
  0x75   : >> { %s338_s12 = scalar_lea.vmem [#allocation2], %s337_s11  ;;  %s718_s23 = scalar_lea.hbm %s1095_s1, 1024 }
  0x76   : >> { %s347_s16 = sshll.u32 %s338_s12, 4  ;;  %s348_s16 = int_to_ptr.vmem [resolvable:$true] %s347_s16 }
  0x79   : >> { %s328_s24 = sadd.s32 %s846_s14, %s1117_s28 }
  0x7a   : >> { %s329_s25 = sld [smem:[#allocation5 + %s328_s24]] }
  0x80   : >> { %p330_p13 = scmp.gt.s32.totalorder %s329_s25, 0  ;;  %p571_p8 = scmp.lt.s32.totalorder %s329_s25, 63 }
  0x82   : >> { %s1136_s25 = smov (!%p330_p13, %s329_s25), 0 }
  0x83   : >> { %s1138_s25 = smov (!%p571_p8, %s1136_s25), 63 }
  0x84   : >> { %s576_s22 = sshll.u32 %s1138_s25, 4 }
  0x85   : >> { %s335_s13 = scalar_lea.hbm %s1095_s1, %s576_s22 }
  0x86   : >> { %s716_s18 = scalar_lea.hbm %s335_s13, 16  ;;  %p719_p11 = scmp.lt.u32.totalorder %s335_s13, %s1095_s1 }
  0x87   : >> { %p717_p10 = scmp.ne.s32.totalorder %s335_s13, %s716_s18  ;;  %p720_p12 = scmp.lt.u32.totalorder %s718_s23, %s716_s18 }
  0x88   : >> { %p722_p1 = scmp.lt.u32.totalorder %s716_s18, %s335_s13 }
  0x89   : >> { %p721_p0 = por %p720_p12, %p719_p11 }
  0x8b   : >> { %p723_p2 = por %p722_p1, %p721_p0 }
  0x8d   : >> { %p724_p3 = pnand %p723_p2, %p717_p10 }
  0x8f   : >> { %727 = shalt.err (!%p724_p3)  }
  0x90   : >> { %s728_s25 = scalar_lea.vmem %s348_s16, 16  ;;  %s850_s11 = smov [#allocation2]  }
  0x91   : >> { %p729_p4 = scmp.ne.s32.totalorder %s348_s16, %s728_s25  ;;  %s730_s12 = sshll.u32 %s850_s11, 4  ;;  %s731_s12 = int_to_ptr.vmem [resolvable:$false] %s730_s12 }
  0x92   : >> { %s732_s22 = scalar_lea.vmem %s731_s12, 256  ;;  %p733_p5 = scmp.lt.s32.totalorder %s348_s16, %s731_s12 }
  0x93   : >> { %p734_p6 = scmp.lt.s32.totalorder %s732_s22, %s728_s25 }
  0x95   : >> { %p735_p7 = por %p734_p6, %p733_p5 }
  0x97   : >> { %p736_p13 = pnand %p735_p7, %p729_p4 }
  0x99   : >> { %739 = shalt.err (!%p736_p13)  }
  0x9a   : >> { %350 = dma.hbm_to_vmem [thread:$0]  %s335_s13, 16, %s348_s16, %s339_s27 }
  0x9b   : >> { %s327_s14 = sadd.s32 1, %s846_s14  }
  0x9c   : >> { %p324_p8 = scmp.ge.s32.totalorder %s327_s14, 8  }
  0x9e   : > { %326 = sbr.rel (!%p324_p8) target bundleno = 115 (0x73), region = 145 }
  0xa5 PF: > { %v355_v0 = vld [vmem:[%s964_s26] sm:$0xff]  ;;  %v851_v1 = vmov 0   ;;  %s578_s0 = sshll.u32 %s958_s21, 3  ;;  %s585_s24 = sshll.u32 %s826_s8, 7 }
  0xa6   : > { %677 = vset.pattern.permute.xlu0 %v851_v1  ;;  %vm360_vm0 = vcmp.eq.s32.totalorder %v355_v0, 2  ;;  %vm359_vm1 = vcmp.eq.s32.totalorder %v355_v0, 1  ;;  %s352_s17 = scalar_lea.vmem [#allocation2], %s578_s0  ;;  %v354_v6 = vld [vmem:[%s1096_s2] sm:$0xff]  ;;  %s1118_s25 = scalar_lea.vmem [#allocation6], %s955_s20 }
  0xa7   : > { %v361_v2 = vsel %vm360_vm0, 1, %v851_v1  ;;  %v375_v3 = vsel %vm359_vm1, 1, %v851_v1  ;;  %v353_v5 = vld [vmem:[%s352_s17] sm:$0xff]  ;;  %s431_s11 = sshll.u32 %s1118_s25, 4  ;;  %s1043_s0 = scalar_lea.hbm %s1101_s7, %s585_s24  ;;  %s1045_s11 = int_to_ptr.vmem [resolvable:$true] %s431_s11 }
  0xa8   : > { %363 = vperm.xlu0 %677, %v361_v2   ;;  %v580_v7 = vld [vmem:[%s1098_s4] ss:$0 sm:$0xff]  ;;  %v579_v8 = vld [vmem:[%s1098_s4 + $0x2] ss:$0 sm:$0xff]  ;;  %v581_v9 = vld [vmem:[%s1098_s4 + $0x1] ss:$0 sm:$0xff]  ;;  %v385_v10 = vadd.f32 %v354_v6, %v353_v5  ;;  %s1119_s17 = smov %s1118_s25 }
  0xa9   : > { %v582_v23 = vld [vmem:[%s1099_s5] ss:$0 sm:$0xff]  ;;  %s1120_s18 = sand.u32 1, %s818_s30   ;;  %s740_s19 = scalar_lea.vmem %s1045_s11, 128 }
  0xaa   : > { %v583_v25 = vld [vmem:[%s1100_s6] ss:$0 sm:$0xff]  ;;  %s417_s28 = scalar_lea.sflag [#allocation7], %s1120_s18  ;;  %p741_p10 = scmp.ne.s32.totalorder %s1045_s11, %s740_s19 }
  0xab   : > { %s852_s8 = smov [#allocation6]  }
  0xac   : > { %377 = vperm.xlu0 %677, %v375_v3   ;;  %p742_p11 = pnand %p741_p10, %p936_p9  ;;  %s744_s14 = sshll.u32 %s852_s8, 4  ;;  %s745_s14 = int_to_ptr.vmem [resolvable:$false] %s744_s14 }
  0xad   : > { %s746_s26 = scalar_lea.vmem %s745_s14, 256  ;;  %p747_p0 = scmp.lt.s32.totalorder %s1045_s11, %s745_s14 }
  0xae   : > { %p743_p12 = pneg %p742_p11  ;;  %p748_p1 = scmp.lt.s32.totalorder %s746_s26, %s740_s19 }
  0xb0   : > { %p749_p2 = por %p748_p1, %p747_p0 }
  0xb2   : > { %p750_p3 = pnand %p749_p2, %p743_p12 }
 0x127   : > { %v364_v4 = vpop.permute.xlu0 %363 }
 0x128   : > { %vm365_vm2 = vcmp.eq.s32.totalorder %v364_v4, 1 }
 0x129   : > { %v374_v12 = vsel %vm365_vm2, %v579_v8, %v580_v7 }
 0x12b   : > { %v378_v11 = vpop.permute.xlu0 %377 }
 0x12c   : > { %vm379_vm3 = vcmp.eq.s32.totalorder %v378_v11, 1 }
 0x12d   : > { %v384_v13 = vsel %vm379_vm3, %v581_v9, %v374_v12 }
 0x12e   : > { %v386_v14 = vadd.f32 %v385_v10, %v384_v13 }
 0x130   : > { %387 = vadd.xlane.f32.xlu1 %v386_v14 }
 0x1bd   : > { %v388_v15 = vpop.xlane.xlu1 %387 }
 0x1be   : > { %v390_v16 = vmul.f32 0.0078125, %v388_v15 }
 0x1c0   : > { %v391_v17 = vsub.f32 %v386_v14, %v390_v16 }
 0x1c2   : > { %v392_v18 = vmul.f32 %v391_v17, %v391_v17 }
 0x1c4   : > { %393 = vadd.xlane.f32.xlu1 %v392_v18 }
 0x251   : > { %v394_v19 = vpop.xlane.xlu1 %393 }
 0x252   : > { %v395_v20 = vmul.f32 0.0078125, %v394_v19 }
 0x254   : > { %v396_v21 = vadd.f32 1e-06, %v395_v20 }
 0x256   : > { %678 = vrsqrt.f32 %v396_v21 }
 0x260   : > { %v679_v22 = vpop.eup %678 }
 0x261   : > { %v398_v24 = vmul.f32 %v679_v22, %v391_v17 }
 0x263   : > { %v406_v26 = vmul.f32 %v582_v23, %v398_v24 }
 0x265   : > { %v414_v27 = vadd.f32 %v583_v25, %v406_v26 }
 0x267   : > { %415 = vst [vmem:[%s1119_s17] sm:$0xff] %v414_v27 }
 0x268   : > { %753 = shalt.err (!%p750_p3)
}
 0x269   : > { %s754_s20 = scalar_lea.hbm %s1043_s0, 128  ;;  %s758_s9 = scalar_lea.hbm %s1101_s7, 256 }
 0x26a   : > { %p755_p4 = scmp.ne.s32.totalorder %s1043_s0, %s754_s20  ;;  %p759_p7 = scmp.lt.u32.totalorder %s1043_s0, %s1101_s7 }
 0x26b   : > { %p760_p13 = scmp.lt.u32.totalorder %s758_s9, %s754_s20  ;;  %p762_p10 = scmp.lt.u32.totalorder %s754_s20, %s1043_s0 }
 0x26c   : > { %p756_p5 = pnand %p755_p4, %p936_p9 }
 0x26d   : > { %p761_p8 = por %p760_p13, %p759_p7 }
 0x26e   : > { %p757_p6 = pneg %p756_p5 }
 0x26f   : > { %p763_p11 = por %p762_p10, %p761_p8 }
 0x271   : > { %p764_p12 = pnand %p763_p11, %p757_p6 }
 0x273   : > { %767 = shalt.err (!%p764_p12)
}
 0x274   : > { %596 = dma.vmem_to_hbm [thread:$0]  (%p936_p9), %s1045_s11, 128, %s1043_s0, %s417_s28  }
 0x275 PF: > { %s1121_s27 = sld [smem:[#allocation20_spill]]  ;;  %p602_p0 = scmp.ge.s32.totalorder %s834_s10, 2 }
 0x276   : > { %s443_s23 = sand.u32 1, %s814_s29  }
 0x277   : > { %s444_s24 = scalar_lea.sflag [#allocation7], %s443_s23 }
 0x27b   : > { %p1122_p1 = scmp.ne.s32.totalorder %s1121_s27, 0 }
 0x27d   : > { %p599_p2 = pnand %p602_p0, %p1122_p1 }
 0x27f   : > { %809 = dma.done.wait (!%p599_p2), %s444_s24, 128  }
 0x280   : > { %811 = vsyncadd (!%p599_p2), %s444_s24, 4294967168  ;;  %s26_s10 = sadd.s32 1, %s834_s10   ;;  %s1123_s25 = sld [smem:[#allocation17_spill]] }
 0x281   : > { %p23_p3 = scmp.ge.s32.totalorder %s26_s10, 4   ;;  %s1124_s0 = sld [smem:[#allocation21_spill]] }
 0x282   : > { %s1125_s8 = sld [smem:[#allocation18_spill]]  ;;  %s1126_s9 = sld [smem:[#allocation19_spill]] }
 0x283   : > { %s1127_s29 = smov %s818_s30  ;;  %25 = sbr.rel (!%p23_p3) target bundleno = 19 (0x13), region = 156 }
 0x286   : > { %s1128_s30 = smov %s1123_s25 }
 0x28a   :  { %449 = vsyncpa [#allocation7], 1 }
 0x28b   :  { %451 = vsyncpa [#allocation7 + $0x1], 1 }
 0x28c   :  { %452 = vsyncmov [#allocation3] }
 0x28f   :  { %s453_s15 = vpop.sfrf %452 }
 0x290   :  { %p588_p9 = scmp.ne.s32.totalorder %s453_s15, 0 }
 0x292   :  { %457 = shalt.err (%p588_p9)  }
 0x293   :  { %459 = vsyncmov [#allocation3 + $0x1] }
 0x296   :  { %s460_s11 = vpop.sfrf %459 }
 0x297   :  { %p589_p4 = scmp.ne.s32.totalorder %s460_s11, 0 }
 0x299   :  { %464 = shalt.err (%p589_p4)  }

</bundles_post_ra>
